<compile_context>
chip_gen: v6e
topology: v6e:2x2x1
jax: 0.10.0
libtpu: 0.0.40
codegen_flags: <defaults>
</compile_context>

<pallas_src>
import functools

import jax
import jax.numpy as jnp
from jax import lax
from jax.experimental import pallas as pl
from jax.experimental.pallas import tpu as pltpu


_TL = 128       # lane width
_SMOOTH = 1e-5


def _pow_abs(a, p):
    """a**p for a >= 0 without exp/log for the common exponents."""
    if p == 1.0:
        return a
    if p == 1.5:
        return a * jnp.sqrt(a)          # EUP sqrt + one VALU mul
    if p == 2.0:
        return a * a
    if p == 3.0:
        return a * a * a
    return jnp.power(a, p)


def _fold_rows(a, sb, tl):
    """(SB, TL) -> (8, TL): sum sublane groups of 8 (tile-aligned vreg adds)."""
    if sb == 8:
        return a
    return jnp.sum(a.reshape(sb // 8, 8, tl), axis=0)


def _nrdice_kernel(score_ref, labels_ref, num_ref, den_ref, *,
                   n_classes, sb, tl, pexp, do_softmax, needs_mask, n_valid):
    i = pl.program_id(1)

    @pl.when(i == 0)
    def _init():
        num_ref[...] = jnp.zeros_like(num_ref)
        den_ref[...] = jnp.zeros_like(den_ref)

    labels = labels_ref[0, 0]                                   # (SB, TL) i32
    xs = [score_ref[0, c].astype(jnp.float32) for c in range(n_classes)]

    # Softmax over the class dim == elementwise max/exp/adds over the C class
    # slices (spatial fills the vreg sublanes/lanes -> no XLU reductions).
    if do_softmax:
        m = xs[0]
        for c in range(1, n_classes):
            m = jnp.maximum(m, xs[c])
        es = [jnp.exp(x - m) for x in xs]                       # EUP exp
        s = es[0]
        for c in range(1, n_classes):
            s = s + es[c]
        inv = 1.0 / s                                           # one recip, C muls
        probs = [e * inv for e in es]
    else:
        probs = xs

    # Tail mask only exists when block coverage over-runs S (trace-time
    # specialization; the common divisible case carries no mask code at all).
    if needs_mask:
        row = lax.broadcasted_iota(jnp.int32, (sb, tl), 0)
        lane = lax.broadcasted_iota(jnp.int32, (sb, tl), 1)
        valid = (i * sb + row) * tl + lane < n_valid
    else:
        valid = None

    for c in range(n_classes):
        p_c = probs[c]
        is_c = labels == c                                      # one-hot as bool
        diff = jnp.abs(jnp.where(is_c, p_c - 1.0, p_c))         # |p - y|
        num_el = _pow_abs(diff, pexp)                           # |p - y| ** p
        den_el = jnp.where(is_c, p_c + 1.0, p_c)                # p_vol + y_vol
        if valid is not None:
            num_el = jnp.where(valid, num_el, 0.0)
            den_el = jnp.where(valid, den_el, 0.0)
        # In-register fold to one vreg per class, then a tiny VMEM RMW.
        num_ref[0, c] += _fold_rows(num_el, sb, tl)
        den_ref[0, c] += _fold_rows(den_el, sb, tl)


def nr_dice_loss(inputs, target, n_classes, p=1.5, softmax=True, weight=None,
                 block_rows=None):
    """Pallas equivalent of NRDiceLoss(n_classes, p, softmax, weight).forward.

    inputs: (B, C, *spatial) float logits (softmax=True) or probabilities.
    target: (B, *spatial) integer class labels in [0, C).
    """
    B, C = int(inputs.shape[0]), int(inputs.shape[1])
    assert C == n_classes, "predict & target class count do not match"
    S = 1
    for d in inputs.shape[2:]:
        S *= int(d)

    if weight is None:
        weight = [1.0] * n_classes

    # Flatten spatial dims; spatial maps onto the (sublane, lane) dims.
    # TODO(synk): bf16-logit variant (halve the dominant HBM stream) not done.
    score = inputs.reshape(B, C, S).astype(jnp.float32)
    labels = jnp.asarray(target, jnp.int32).reshape(B, 1, S)

    s_pad = pl.cdiv(S, 8 * _TL) * (8 * _TL)        # rows always a multiple of 8
    if s_pad != S:
        # TODO(synk): ragged spatial extents take one HBM pad copy here; a
        # flat lane-masked fallback layout would avoid it.
        score = jnp.pad(score, ((0, 0), (0, 0), (0, s_pad - S)))
        labels = jnp.pad(labels, ((0, 0), (0, 0), (0, s_pad - S)))
    sr = s_pad // _TL                              # spatial rows (multiple of 8)
    score = score.reshape(B, C, sr, _TL)           # free reshape (contiguous)
    labels = labels.reshape(B, 1, sr, _TL)

    if block_rows is None:
        # ~2 MiB of score per grid step, C-aware, sublane dim multiple of 8.
        block_rows = max(8, ((2 << 20) // (C * _TL * 4)) // 8 * 8)
    sb = max(8, (min(int(block_rows), sr) // 8) * 8)
    n_chunks = pl.cdiv(sr, sb)
    needs_mask = (n_chunks * sb * _TL != S)

    kernel = functools.partial(
        _nrdice_kernel, n_classes=C, sb=sb, tl=_TL, pexp=float(p),
        do_softmax=bool(softmax), needs_mask=needs_mask, n_valid=S)

    # Derived VMEM budget: double-buffered input blocks + resident outputs +
    # headroom for the per-class elementwise temporaries (never below the
    # compiler default, never above 48 MiB so v7x keeps headroom).
    score_blk = C * sb * _TL * 4
    label_blk = sb * _TL * 4
    out_blk = 2 * C * 8 * _TL * 4
    est = 2 * (score_blk + label_blk) + 2 * out_blk \
        + 2 * (2 * C + 8) * sb * _TL * 4 + (2 << 20)
    vmem_limit = int(min(max(est, 32 << 20), 48 << 20))

    num_b, den_b = pl.pallas_call(
        kernel,
        out_shape=(jax.ShapeDtypeStruct((B, C, 8, _TL), jnp.float32),
                   jax.ShapeDtypeStruct((B, C, 8, _TL), jnp.float32)),
        grid_spec=pltpu.PrefetchScalarGridSpec(
            num_scalar_prefetch=0,
            grid=(B, n_chunks),
            in_specs=[
                pl.BlockSpec((1, C, sb, _TL), lambda b, i: (b, 0, i, 0)),
                pl.BlockSpec((1, 1, sb, _TL), lambda b, i: (b, 0, i, 0)),
            ],
            out_specs=(
                pl.BlockSpec((1, C, 8, _TL), lambda b, i: (b, 0, 0, 0)),
                pl.BlockSpec((1, C, 8, _TL), lambda b, i: (b, 0, 0, 0)),
            ),
        ),
        compiler_params=pltpu.CompilerParams(
            dimension_semantics=("parallel", "arbitrary"),
            vmem_limit_bytes=vmem_limit),
    )(score, labels)

    # Tiny finalize in plain JAX: per-class NR-Dice + class-weighted mean.
    num_c = jnp.sum(num_b, axis=(0, 2, 3))                      # (C,)
    den_c = jnp.sum(den_b, axis=(0, 2, 3))                      # (C,)
    per_class = (num_c + _SMOOTH) / (den_c + _SMOOTH)
    w = jnp.asarray([float(wi) for wi in weight], dtype=jnp.float32)
    return jnp.sum(per_class * w) / n_classes


def _nr_dice_loss_ref(inputs, target, n_classes, p=1.5, softmax=True,
                      weight=None):
    """Plain-JAX reference matching the PyTorch NRDiceLoss module."""
    if softmax:
        inputs = jax.nn.softmax(inputs, axis=1)
    if weight is None:
        weight = [1.0] * n_classes
    soft_y = jax.nn.one_hot(jnp.asarray(target, jnp.int32), n_classes,
                            axis=1, dtype=jnp.float32)
    loss = 0.0
    for i in range(n_classes):
        pr = inputs[:, i].reshape(-1)
        sy = soft_y[:, i].reshape(-1)
        numerator = jnp.sum(jnp.abs(pr - sy) ** p)
        y_vol = jnp.sum(sy)
        p_vol = jnp.sum(pr)
        loss = loss + (numerator + _SMOOTH) / (y_vol + p_vol + _SMOOTH) * weight[i]
    return loss / n_classes


if __name__ == "__main__":
    key = jax.random.PRNGKey(0)

    # 1) C < 8, divisible spatial extent -> no tail mask, single chunk.
    k1, k2, key = jax.random.split(key, 3)
    x1 = jax.random.normal(k1, (2, 4, 4, 16, 16), dtype=jnp.float32)
    y1 = jax.random.randint(k2, (2, 4, 16, 16), 0, 4, dtype=jnp.int32)
    got1 = jax.block_until_ready(nr_dice_loss(x1, y1, n_classes=4, p=1.5))
    ref1 = _nr_dice_loss_ref(x1, y1, n_classes=4, p=1.5)
    assert jnp.allclose(got1, ref1, rtol=1e-3, atol=1e-6), (got1, ref1)

    # 2) ragged spatial extent + class weights -> padded, masked-tail path.
    k1, k2, key = jax.random.split(key, 3)
    x2 = jax.random.normal(k1, (2, 3, 5, 7, 9), dtype=jnp.float32)
    y2 = jax.random.randint(k2, (2, 5, 7, 9), 0, 3, dtype=jnp.int32)
    wgt = [0.2, 0.3, 0.5]
    got2 = jax.block_until_ready(
        nr_dice_loss(x2, y2, n_classes=3, p=1.5, weight=wgt))
    ref2 = _nr_dice_loss_ref(x2, y2, n_classes=3, p=1.5, weight=wgt)
    assert jnp.allclose(got2, ref2, rtol=1e-3, atol=1e-6), (got2, ref2)

    # 3) multi-chunk accumulation + in-register sublane fold (sb > 8), p = 2.
    k1, k2, key = jax.random.split(key, 3)
    x3 = jax.random.normal(k1, (2, 2, 8, 32, 32), dtype=jnp.float32)
    y3 = jax.random.randint(k2, (2, 8, 32, 32), 0, 2, dtype=jnp.int32)
    got3 = jax.block_until_ready(
        nr_dice_loss(x3, y3, n_classes=2, p=2.0, block_rows=16))
    ref3 = _nr_dice_loss_ref(x3, y3, n_classes=2, p=2.0)
    assert jnp.allclose(got3, ref3, rtol=1e-3, atol=1e-6), (got3, ref3)

    print("KERNEL_OK")
</pallas_src>

<mosaic_0001>
module attributes {stable_mosaic.version = 11 : i64} {
  func.func @_nrdice_kernel(%arg0: i32, %arg1: i32, %arg2: memref<1x4x8x128xf32, #tpu.memory_space<vmem>>, %arg3: memref<1x1x8x128xi32, #tpu.memory_space<vmem>>, %arg4: memref<1x4x8x128xf32, #tpu.memory_space<vmem>>, %arg5: memref<1x4x8x128xf32, #tpu.memory_space<vmem>>) attributes {dimension_semantics = [#tpu.dimension_semantics<parallel>, #tpu.dimension_semantics<arbitrary>], iteration_bounds = array<i64: 2, 1>, scalar_prefetch = 0 : i64, scratch_operands = 0 : i64, tpu.core_type = #tpu.core_type<tc>, window_params = [{transform_indices = @transform_0, window_bounds = array<i64: 1, 4, 8, 128>}, {transform_indices = @transform_1, window_bounds = array<i64: 1, 1, 8, 128>}, {transform_indices = @transform_2, window_bounds = array<i64: 1, 4, 8, 128>}, {transform_indices = @transform_3, window_bounds = array<i64: 1, 4, 8, 128>}]} {
    %c0_i32 = arith.constant 0 : i32
    %0 = arith.cmpi eq, %arg1, %c0_i32 : i32
    %1 = arith.extui %0 : i1 to i32
    %c0_i32_0 = arith.constant 0 : i32
    %2 = arith.cmpi ne, %1, %c0_i32_0 : i32
    scf.if %2 {
      %cst_90 = arith.constant 0.000000e+00 : f32
      %125 = vector.broadcast %cst_90 : f32 to vector<1x4x8x128xf32>
      %c0_91 = arith.constant 0 : index
      %c0_92 = arith.constant 0 : index
      %c0_93 = arith.constant 0 : index
      %c0_94 = arith.constant 0 : index
      %126 = vector.load %arg4[%c0_91, %c0_92, %c0_93, %c0_94] : memref<1x4x8x128xf32, #tpu.memory_space<vmem>>, vector<1x4x8x128xf32>
      tpu.vector_store %arg4[%c0_91, %c0_92, %c0_93, %c0_94], %125 {strides = array<i32>} : memref<1x4x8x128xf32, #tpu.memory_space<vmem>>, vector<1x4x8x128xf32>,
      %cst_95 = arith.constant 0.000000e+00 : f32
      %127 = vector.broadcast %cst_95 : f32 to vector<1x4x8x128xf32>
      %c0_96 = arith.constant 0 : index
      %c0_97 = arith.constant 0 : index
      %c0_98 = arith.constant 0 : index
      %c0_99 = arith.constant 0 : index
      %128 = vector.load %arg5[%c0_96, %c0_97, %c0_98, %c0_99] : memref<1x4x8x128xf32, #tpu.memory_space<vmem>>, vector<1x4x8x128xf32>
      tpu.vector_store %arg5[%c0_96, %c0_97, %c0_98, %c0_99], %127 {strides = array<i32>} : memref<1x4x8x128xf32, #tpu.memory_space<vmem>>, vector<1x4x8x128xf32>,
    } else {
    }
    %c0 = arith.constant 0 : index
    %c0_1 = arith.constant 0 : index
    %c0_2 = arith.constant 0 : index
    %c0_3 = arith.constant 0 : index
    %3 = vector.load %arg3[%c0, %c0_1, %c0_2, %c0_3] : memref<1x1x8x128xi32, #tpu.memory_space<vmem>>, vector<1x1x8x128xi32>
    %4 = vector.shape_cast %3 : vector<1x1x8x128xi32> to vector<8x128xi32>
    %c0_4 = arith.constant 0 : index
    %c0_5 = arith.constant 0 : index
    %c0_6 = arith.constant 0 : index
    %c0_7 = arith.constant 0 : index
    %5 = vector.load %arg2[%c0_4, %c0_5, %c0_6, %c0_7] : memref<1x4x8x128xf32, #tpu.memory_space<vmem>>, vector<1x1x8x128xf32>
    %6 = vector.shape_cast %5 : vector<1x1x8x128xf32> to vector<8x128xf32>
    %c0_8 = arith.constant 0 : index
    %c1 = arith.constant 1 : index
    %c0_9 = arith.constant 0 : index
    %c0_10 = arith.constant 0 : index
    %7 = vector.load %arg2[%c0_8, %c1, %c0_9, %c0_10] : memref<1x4x8x128xf32, #tpu.memory_space<vmem>>, vector<1x1x8x128xf32>
    %8 = vector.shape_cast %7 : vector<1x1x8x128xf32> to vector<8x128xf32>
    %c0_11 = arith.constant 0 : index
    %c2 = arith.constant 2 : index
    %c0_12 = arith.constant 0 : index
    %c0_13 = arith.constant 0 : index
    %9 = vector.load %arg2[%c0_11, %c2, %c0_12, %c0_13] : memref<1x4x8x128xf32, #tpu.memory_space<vmem>>, vector<1x1x8x128xf32>
    %10 = vector.shape_cast %9 : vector<1x1x8x128xf32> to vector<8x128xf32>
    %c0_14 = arith.constant 0 : index
    %c3 = arith.constant 3 : index
    %c0_15 = arith.constant 0 : index
    %c0_16 = arith.constant 0 : index
    %11 = vector.load %arg2[%c0_14, %c3, %c0_15, %c0_16] : memref<1x4x8x128xf32, #tpu.memory_space<vmem>>, vector<1x1x8x128xf32>
    %12 = vector.shape_cast %11 : vector<1x1x8x128xf32> to vector<8x128xf32>
    %13 = arith.maximumf %6, %8 : vector<8x128xf32>
    %14 = arith.maximumf %13, %10 : vector<8x128xf32>
    %15 = arith.maximumf %14, %12 : vector<8x128xf32>
    %16 = arith.subf %6, %15 : vector<8x128xf32>
    %17 = math.exp %16 : vector<8x128xf32>
    %18 = arith.subf %8, %15 : vector<8x128xf32>
    %19 = math.exp %18 : vector<8x128xf32>
    %20 = arith.subf %10, %15 : vector<8x128xf32>
    %21 = math.exp %20 : vector<8x128xf32>
    %22 = arith.subf %12, %15 : vector<8x128xf32>
    %23 = math.exp %22 : vector<8x128xf32>
    %24 = arith.addf %17, %19 : vector<8x128xf32>
    %25 = arith.addf %24, %21 : vector<8x128xf32>
    %26 = arith.addf %25, %23 : vector<8x128xf32>
    %cst = arith.constant 1.000000e+00 : f32
    %27 = vector.broadcast %cst : f32 to vector<8x128xf32>
    %28 = arith.divf %27, %26 : vector<8x128xf32>
    %29 = arith.mulf %17, %28 : vector<8x128xf32>
    %30 = arith.mulf %19, %28 : vector<8x128xf32>
    %31 = arith.mulf %21, %28 : vector<8x128xf32>
    %32 = arith.mulf %23, %28 : vector<8x128xf32>
    %c0_i32_17 = arith.constant 0 : i32
    %33 = vector.broadcast %c0_i32_17 : i32 to vector<8x128xi32>
    %34 = arith.cmpi eq, %4, %33 : vector<8x128xi32>
    %cst_18 = arith.constant 1.000000e+00 : f32
    %35 = vector.broadcast %cst_18 : f32 to vector<8x128xf32>
    %36 = arith.subf %29, %35 : vector<8x128xf32>
    %37 = arith.select %34, %36, %29 : vector<8x128xi1>, vector<8x128xf32>
    %38 = math.absf %37 : vector<8x128xf32>
    %39 = math.sqrt %38 : vector<8x128xf32>
    %40 = arith.mulf %38, %39 : vector<8x128xf32>
    %cst_19 = arith.constant 1.000000e+00 : f32
    %41 = vector.broadcast %cst_19 : f32 to vector<8x128xf32>
    %42 = arith.addf %29, %41 : vector<8x128xf32>
    %43 = arith.select %34, %42, %29 : vector<8x128xi1>, vector<8x128xf32>
    %c0_20 = arith.constant 0 : index
    %c0_21 = arith.constant 0 : index
    %c0_22 = arith.constant 0 : index
    %c0_23 = arith.constant 0 : index
    %44 = vector.load %arg4[%c0_20, %c0_21, %c0_22, %c0_23] : memref<1x4x8x128xf32, #tpu.memory_space<vmem>>, vector<1x1x8x128xf32>
    %45 = vector.shape_cast %44 : vector<1x1x8x128xf32> to vector<8x128xf32>
    %46 = arith.addf %45, %40 : vector<8x128xf32>
    %c0_24 = arith.constant 0 : index
    %c0_25 = arith.constant 0 : index
    %c0_26 = arith.constant 0 : index
    %c0_27 = arith.constant 0 : index
    %47 = vector.load %arg4[%c0_24, %c0_25, %c0_26, %c0_27] : memref<1x4x8x128xf32, #tpu.memory_space<vmem>>, vector<1x1x8x128xf32>
    %48 = vector.shape_cast %47 : vector<1x1x8x128xf32> to vector<8x128xf32>
    %49 = vector.shape_cast %46 : vector<8x128xf32> to vector<1x1x8x128xf32>
    tpu.vector_store %arg4[%c0_24, %c0_25, %c0_26, %c0_27], %49 {strides = array<i32>} : memref<1x4x8x128xf32, #tpu.memory_space<vmem>>, vector<1x1x8x128xf32>,
    %c0_28 = arith.constant 0 : index
    %c0_29 = arith.constant 0 : index
    %c0_30 = arith.constant 0 : index
    %c0_31 = arith.constant 0 : index
    %50 = vector.load %arg5[%c0_28, %c0_29, %c0_30, %c0_31] : memref<1x4x8x128xf32, #tpu.memory_space<vmem>>, vector<1x1x8x128xf32>
    %51 = vector.shape_cast %50 : vector<1x1x8x128xf32> to vector<8x128xf32>
    %52 = arith.addf %51, %43 : vector<8x128xf32>
    %c0_32 = arith.constant 0 : index
    %c0_33 = arith.constant 0 : index
    %c0_34 = arith.constant 0 : index
    %c0_35 = arith.constant 0 : index
    %53 = vector.load %arg5[%c0_32, %c0_33, %c0_34, %c0_35] : memref<1x4x8x128xf32, #tpu.memory_space<vmem>>, vector<1x1x8x128xf32>
    %54 = vector.shape_cast %53 : vector<1x1x8x128xf32> to vector<8x128xf32>
    %55 = vector.shape_cast %52 : vector<8x128xf32> to vector<1x1x8x128xf32>
    tpu.vector_store %arg5[%c0_32, %c0_33, %c0_34, %c0_35], %55 {strides = array<i32>} : memref<1x4x8x128xf32, #tpu.memory_space<vmem>>, vector<1x1x8x128xf32>,
    %c1_i32 = arith.constant 1 : i32
    %56 = vector.broadcast %c1_i32 : i32 to vector<8x128xi32>
    %57 = arith.cmpi eq, %4, %56 : vector<8x128xi32>
    %cst_36 = arith.constant 1.000000e+00 : f32
    %58 = vector.broadcast %cst_36 : f32 to vector<8x128xf32>
    %59 = arith.subf %30, %58 : vector<8x128xf32>
    %60 = arith.select %57, %59, %30 : vector<8x128xi1>, vector<8x128xf32>
    %61 = math.absf %60 : vector<8x128xf32>
    %62 = math.sqrt %61 : vector<8x128xf32>
    %63 = arith.mulf %61, %62 : vector<8x128xf32>
    %cst_37 = arith.constant 1.000000e+00 : f32
    %64 = vector.broadcast %cst_37 : f32 to vector<8x128xf32>
    %65 = arith.addf %30, %64 : vector<8x128xf32>
    %66 = arith.select %57, %65, %30 : vector<8x128xi1>, vector<8x128xf32>
    %c0_38 = arith.constant 0 : index
    %c1_39 = arith.constant 1 : index
    %c0_40 = arith.constant 0 : index
    %c0_41 = arith.constant 0 : index
    %67 = vector.load %arg4[%c0_38, %c1_39, %c0_40, %c0_41] : memref<1x4x8x128xf32, #tpu.memory_space<vmem>>, vector<1x1x8x128xf32>
    %68 = vector.shape_cast %67 : vector<1x1x8x128xf32> to vector<8x128xf32>
    %69 = arith.addf %68, %63 : vector<8x128xf32>
    %c0_42 = arith.constant 0 : index
    %c1_43 = arith.constant 1 : index
    %c0_44 = arith.constant 0 : index
    %c0_45 = arith.constant 0 : index
    %70 = vector.load %arg4[%c0_42, %c1_43, %c0_44, %c0_45] : memref<1x4x8x128xf32, #tpu.memory_space<vmem>>, vector<1x1x8x128xf32>
    %71 = vector.shape_cast %70 : vector<1x1x8x128xf32> to vector<8x128xf32>
    %72 = vector.shape_cast %69 : vector<8x128xf32> to vector<1x1x8x128xf32>
    tpu.vector_store %arg4[%c0_42, %c1_43, %c0_44, %c0_45], %72 {strides = array<i32>} : memref<1x4x8x128xf32, #tpu.memory_space<vmem>>, vector<1x1x8x128xf32>,
    %c0_46 = arith.constant 0 : index
    %c1_47 = arith.constant 1 : index
    %c0_48 = arith.constant 0 : index
    %c0_49 = arith.constant 0 : index
    %73 = vector.load %arg5[%c0_46, %c1_47, %c0_48, %c0_49] : memref<1x4x8x128xf32, #tpu.memory_space<vmem>>, vector<1x1x8x128xf32>
    %74 = vector.shape_cast %73 : vector<1x1x8x128xf32> to vector<8x128xf32>
    %75 = arith.addf %74, %66 : vector<8x128xf32>
    %c0_50 = arith.constant 0 : index
    %c1_51 = arith.constant 1 : index
    %c0_52 = arith.constant 0 : index
    %c0_53 = arith.constant 0 : index
    %76 = vector.load %arg5[%c0_50, %c1_51, %c0_52, %c0_53] : memref<1x4x8x128xf32, #tpu.memory_space<vmem>>, vector<1x1x8x128xf32>
    %77 = vector.shape_cast %76 : vector<1x1x8x128xf32> to vector<8x128xf32>
    %78 = vector.shape_cast %75 : vector<8x128xf32> to vector<1x1x8x128xf32>
    tpu.vector_store %arg5[%c0_50, %c1_51, %c0_52, %c0_53], %78 {strides = array<i32>} : memref<1x4x8x128xf32, #tpu.memory_space<vmem>>, vector<1x1x8x128xf32>,
    %c2_i32 = arith.constant 2 : i32
    %79 = vector.broadcast %c2_i32 : i32 to vector<8x128xi32>
    %80 = arith.cmpi eq, %4, %79 : vector<8x128xi32>
    %cst_54 = arith.constant 1.000000e+00 : f32
    %81 = vector.broadcast %cst_54 : f32 to vector<8x128xf32>
    %82 = arith.subf %31, %81 : vector<8x128xf32>
    %83 = arith.select %80, %82, %31 : vector<8x128xi1>, vector<8x128xf32>
    %84 = math.absf %83 : vector<8x128xf32>
    %85 = math.sqrt %84 : vector<8x128xf32>
    %86 = arith.mulf %84, %85 : vector<8x128xf32>
    %cst_55 = arith.constant 1.000000e+00 : f32
    %87 = vector.broadcast %cst_55 : f32 to vector<8x128xf32>
    %88 = arith.addf %31, %87 : vector<8x128xf32>
    %89 = arith.select %80, %88, %31 : vector<8x128xi1>, vector<8x128xf32>
    %c0_56 = arith.constant 0 : index
    %c2_57 = arith.constant 2 : index
    %c0_58 = arith.constant 0 : index
    %c0_59 = arith.constant 0 : index
    %90 = vector.load %arg4[%c0_56, %c2_57, %c0_58, %c0_59] : memref<1x4x8x128xf32, #tpu.memory_space<vmem>>, vector<1x1x8x128xf32>
    %91 = vector.shape_cast %90 : vector<1x1x8x128xf32> to vector<8x128xf32>
    %92 = arith.addf %91, %86 : vector<8x128xf32>
    %c0_60 = arith.constant 0 : index
    %c2_61 = arith.constant 2 : index
    %c0_62 = arith.constant 0 : index
    %c0_63 = arith.constant 0 : index
    %93 = vector.load %arg4[%c0_60, %c2_61, %c0_62, %c0_63] : memref<1x4x8x128xf32, #tpu.memory_space<vmem>>, vector<1x1x8x128xf32>
    %94 = vector.shape_cast %93 : vector<1x1x8x128xf32> to vector<8x128xf32>
    %95 = vector.shape_cast %92 : vector<8x128xf32> to vector<1x1x8x128xf32>
    tpu.vector_store %arg4[%c0_60, %c2_61, %c0_62, %c0_63], %95 {strides = array<i32>} : memref<1x4x8x128xf32, #tpu.memory_space<vmem>>, vector<1x1x8x128xf32>,
    %c0_64 = arith.constant 0 : index
    %c2_65 = arith.constant 2 : index
    %c0_66 = arith.constant 0 : index
    %c0_67 = arith.constant 0 : index
    %96 = vector.load %arg5[%c0_64, %c2_65, %c0_66, %c0_67] : memref<1x4x8x128xf32, #tpu.memory_space<vmem>>, vector<1x1x8x128xf32>
    %97 = vector.shape_cast %96 : vector<1x1x8x128xf32> to vector<8x128xf32>
    %98 = arith.addf %97, %89 : vector<8x128xf32>
    %c0_68 = arith.constant 0 : index
    %c2_69 = arith.constant 2 : index
    %c0_70 = arith.constant 0 : index
    %c0_71 = arith.constant 0 : index
    %99 = vector.load %arg5[%c0_68, %c2_69, %c0_70, %c0_71] : memref<1x4x8x128xf32, #tpu.memory_space<vmem>>, vector<1x1x8x128xf32>
    %100 = vector.shape_cast %99 : vector<1x1x8x128xf32> to vector<8x128xf32>
    %101 = vector.shape_cast %98 : vector<8x128xf32> to vector<1x1x8x128xf32>
    tpu.vector_store %arg5[%c0_68, %c2_69, %c0_70, %c0_71], %101 {strides = array<i32>} : memref<1x4x8x128xf32, #tpu.memory_space<vmem>>, vector<1x1x8x128xf32>,
    %c3_i32 = arith.constant 3 : i32
    %102 = vector.broadcast %c3_i32 : i32 to vector<8x128xi32>
    %103 = arith.cmpi eq, %4, %102 : vector<8x128xi32>
    %cst_72 = arith.constant 1.000000e+00 : f32
    %104 = vector.broadcast %cst_72 : f32 to vector<8x128xf32>
    %105 = arith.subf %32, %104 : vector<8x128xf32>
    %106 = arith.select %103, %105, %32 : vector<8x128xi1>, vector<8x128xf32>
    %107 = math.absf %106 : vector<8x128xf32>
    %108 = math.sqrt %107 : vector<8x128xf32>
    %109 = arith.mulf %107, %108 : vector<8x128xf32>
    %cst_73 = arith.constant 1.000000e+00 : f32
    %110 = vector.broadcast %cst_73 : f32 to vector<8x128xf32>
    %111 = arith.addf %32, %110 : vector<8x128xf32>
    %112 = arith.select %103, %111, %32 : vector<8x128xi1>, vector<8x128xf32>
    %c0_74 = arith.constant 0 : index
    %c3_75 = arith.constant 3 : index
    %c0_76 = arith.constant 0 : index
    %c0_77 = arith.constant 0 : index
    %113 = vector.load %arg4[%c0_74, %c3_75, %c0_76, %c0_77] : memref<1x4x8x128xf32, #tpu.memory_space<vmem>>, vector<1x1x8x128xf32>
    %114 = vector.shape_cast %113 : vector<1x1x8x128xf32> to vector<8x128xf32>
    %115 = arith.addf %114, %109 : vector<8x128xf32>
    %c0_78 = arith.constant 0 : index
    %c3_79 = arith.constant 3 : index
    %c0_80 = arith.constant 0 : index
    %c0_81 = arith.constant 0 : index
    %116 = vector.load %arg4[%c0_78, %c3_79, %c0_80, %c0_81] : memref<1x4x8x128xf32, #tpu.memory_space<vmem>>, vector<1x1x8x128xf32>
    %117 = vector.shape_cast %116 : vector<1x1x8x128xf32> to vector<8x128xf32>
    %118 = vector.shape_cast %115 : vector<8x128xf32> to vector<1x1x8x128xf32>
    tpu.vector_store %arg4[%c0_78, %c3_79, %c0_80, %c0_81], %118 {strides = array<i32>} : memref<1x4x8x128xf32, #tpu.memory_space<vmem>>, vector<1x1x8x128xf32>,
    %c0_82 = arith.constant 0 : index
    %c3_83 = arith.constant 3 : index
    %c0_84 = arith.constant 0 : index
    %c0_85 = arith.constant 0 : index
    %119 = vector.load %arg5[%c0_82, %c3_83, %c0_84, %c0_85] : memref<1x4x8x128xf32, #tpu.memory_space<vmem>>, vector<1x1x8x128xf32>
    %120 = vector.shape_cast %119 : vector<1x1x8x128xf32> to vector<8x128xf32>
    %121 = arith.addf %120, %112 : vector<8x128xf32>
    %c0_86 = arith.constant 0 : index
    %c3_87 = arith.constant 3 : index
    %c0_88 = arith.constant 0 : index
    %c0_89 = arith.constant 0 : index
    %122 = vector.load %arg5[%c0_86, %c3_87, %c0_88, %c0_89] : memref<1x4x8x128xf32, #tpu.memory_space<vmem>>, vector<1x1x8x128xf32>
    %123 = vector.shape_cast %122 : vector<1x1x8x128xf32> to vector<8x128xf32>
    %124 = vector.shape_cast %121 : vector<8x128xf32> to vector<1x1x8x128xf32>
    tpu.vector_store %arg5[%c0_86, %c3_87, %c0_88, %c0_89], %124 {strides = array<i32>} : memref<1x4x8x128xf32, #tpu.memory_space<vmem>>, vector<1x1x8x128xf32>,
    return
  }
  func.func @transform_0(%arg0: i32, %arg1: i32) -> (i32, i32, i32, i32) {
    %c0_i32 = arith.constant 0 : i32
    %c0_i32_0 = arith.constant 0 : i32
    %c0_i32_1 = arith.constant 0 : i32
    return %arg0, %c0_i32, %arg1, %c0_i32_0 : i32, i32, i32, i32
  }
  func.func @transform_1(%arg0: i32, %arg1: i32) -> (i32, i32, i32, i32) {
    %c0_i32 = arith.constant 0 : i32
    %c0_i32_0 = arith.constant 0 : i32
    %c0_i32_1 = arith.constant 0 : i32
    return %arg0, %c0_i32, %arg1, %c0_i32_0 : i32, i32, i32, i32
  }
  func.func @transform_2(%arg0: i32, %arg1: i32) -> (i32, i32, i32, i32) {
    %c0_i32 = arith.constant 0 : i32
    %c0_i32_0 = arith.constant 0 : i32
    %c0_i32_1 = arith.constant 0 : i32
    %c0_i32_2 = arith.constant 0 : i32
    return %arg0, %c0_i32, %c0_i32_0, %c0_i32_1 : i32, i32, i32, i32
  }
  func.func @transform_3(%arg0: i32, %arg1: i32) -> (i32, i32, i32, i32) {
    %c0_i32 = arith.constant 0 : i32
    %c0_i32_0 = arith.constant 0 : i32
    %c0_i32_1 = arith.constant 0 : i32
    %c0_i32_2 = arith.constant 0 : i32
    return %arg0, %c0_i32, %c0_i32_0, %c0_i32_1 : i32, i32, i32, i32
  }
}

</mosaic_0001>

<bundles_post_ra>
// kernel: tpu_custom_call.1
= control target key start
LH: loop header
LB: loop body
LE: loop exit
PB: predicated region body
PF: predicated region fallthrough
CT: control target
= control target key end

     0   :  { %s1157_s0 = inlined_call_operand.hbm [shape: f32[2,4,8,128], index: 0, kind: input, shape index: {}]   ;;  %s1158_s1 = inlined_call_operand.hbm [shape: s32[2,1,8,128], index: 1, kind: input, shape index: {}]   ;;  %s1159_s2 = inlined_call_operand.hbm [shape: f32[2,4,8,128], index: 2, kind: output, shape index: {0}]   ;;  %s1160_s3 = inlined_call_operand.hbm [shape: f32[2,4,8,128], index: 3, kind: output, shape index: {1}]  }
   0x1   :  { %1161 = sst [smem:[#allocation14_spill]] %s1157_s0 }
   0x2   :  { %9 = vsyncpa [#allocation3], 0 }
   0x3   :  { %11 = vsyncpa [#allocation3 + $0x1], 0 }
   0x4   :  { %12 = vsyncpa [#allocation6], 0 }
   0x5   :  { %14 = vsyncpa [#allocation6 + $0x1], 0 }
   0x6   :  { %15 = vsyncpa [#allocation4], 0 }
   0x7   :  { %17 = vsyncpa [#allocation4 + $0x1], 0 }
   0x8   :  { %18 = vsyncpa [#allocation9], 0 }
   0x9   :  { %20 = vsyncpa [#allocation9 + $0x1], 0  ;;  %s898_s12 = smov 0   ;;  %s900_s13 = smov 0  }
   0xa   :  { %s902_s14 = smov 0   ;;  %s904_s15 = smov 0  }
   0xb   :  { %s906_s16 = smov 0   ;;  %s908_s17 = smov 0  }
   0xc LB: > { %s559_s18 = sadd.s32 4294967295, %s868_s17   ;;  %s560_s19 = sadd.s32 4294967294, %s868_s17   ;;  %s868_s17 = sphi %s908_s17, %s26_s17   ;;  %s864_s16 = sphi %s906_s16, %s1173_s16   ;;  %s860_s15 = sphi %s904_s15, %s1172_s15   ;;  %s856_s14 = sphi %s902_s14, %s1171_s14   ;;  %s852_s13 = sphi %s900_s13, %s1170_s13   ;;  %s848_s12 = sphi %s898_s12, %s1169_s12  }
   0xd   : > { %s38_s20 = sadd.s32 1, %s864_s16  ;;  %s47_s21 = sadd.s32 1, %s856_s14 }
   0xe   : > { %p40_p0 = scmp.ge.s32.totalorder %s38_s20, 2  ;;  %p54_p1 = scmp.ne.s32.totalorder %s856_s14, %s852_s13 }
   0xf   : > { %p55_p2 = scmp.eq.s32.totalorder %s868_s17, 0  ;;  %p60_p3 = scmp.ne.s32.totalorder %s852_s13, %s848_s12 }
  0x10   : > { %s1175_s20 = smov (%p40_p0, %s38_s20), 0  ;;  %p61_p5 = scmp.eq.s32.totalorder %s559_s18, 0 }
  0x11   : > { %p939_p4 = por %p55_p2, %p54_p1  ;;  %s42_s23 = ssub.s32 %s864_s16, %s1175_s20 }
  0x12   : > { %p112_p6 = scmp.eq.s32.totalorder %s559_s18, 1  ;;  %p45_p7 = scmp.eq.s32.totalorder %s42_s23, 0 }
  0x13   : > { %p945_p8 = por %p61_p5, %p60_p3  ;;  %p118_p10 = scmp.eq.s32.totalorder %s560_s19, 1 }
  0x14   : > { %p949_p9 = por %p112_p6, %p54_p1  ;;  %p562_p12 = scmp.ge.s32.totalorder %s868_s17, 2 }
  0x15   : > { %s954_s26 = scalar_select %p45_p7, %s856_s14, %s47_s21  }
  0x16   : > { %p956_p11 = por %p118_p10, %p60_p3  ;;  %p625_p13 = scmp.lt.s32.totalorder %s868_s17, 2 }
  0x17   : > { %s963_s28 = sand.u32 1, %s856_s14   ;;  %s600_s30 = sshll.u32 %s864_s16, 9 }
  0x18   : > { %s563_s29 = sshll.u32 %s963_s28, 5  ;;  %s1166_s0 = sld [smem:[#allocation14_spill]] }
  0x19   : > { %s168_s7 = scalar_lea.vmem [#allocation2], %s563_s29  ;;  %p972_p0 = pnand %p625_p13, %p939_p4 }
  0x1a   : > { %s176_s8 = sshll.u32 %s168_s7, 4  ;;  %p568_p1 = scmp.ge.s32.totalorder %s868_s17, 1  ;;  %s177_s8 = int_to_ptr.vmem [resolvable:$true] %s176_s8 }
  0x1b   : > { %s165_s10 = scalar_lea.sflag [#allocation3], %s963_s28  ;;  %p700_p2 = pneg %p972_p0 }
  0x1c   : > { %s711_s11 = scalar_lea.vmem %s177_s8, 512  ;;  %s870_s18 = smov [#allocation2]  }
  0x1d   : > { %p712_p3 = scmp.ne.s32.totalorder %s177_s8, %s711_s11  ;;  %s716_s19 = sshll.u32 %s870_s18, 4  ;;  %s717_s19 = int_to_ptr.vmem [resolvable:$false] %s716_s19 }
  0x1e   : > { %s175_s6 = scalar_lea.hbm %s1166_s0, %s600_s30  ;;  %s718_s21 = scalar_lea.vmem %s717_s19, 1024 }
  0x1f   : > { %p714_p5 = pnand %p712_p3, %p700_p2  ;;  %p719_p4 = scmp.lt.s32.totalorder %s177_s8, %s717_s19 }
  0x20   : > { %p720_p7 = scmp.lt.s32.totalorder %s718_s21, %s711_s11 }
  0x21   : > { %p715_p6 = pneg %p714_p5 }
  0x22   : > { %p721_p10 = por %p720_p7, %p719_p4 }
  0x24   : > { %p722_p13 = pnand %p721_p10, %p715_p6 }
  0x26   : > { %725 = shalt.err (!%p722_p13)
}
  0x27   : > { %s871_s22 = smov 128   ;;  %s872_s23 = smov 8  }
  0x28   : > { %614 = dma.hbm_to_vmem [thread:$0]  (!%p972_p0), %s175_s6, 512, %s177_s8, %s165_s10, %s871_s22, %s871_s22, %s872_s23  }
  0x29   : > { %p203_p3 = scmp.lt.s32.totalorder %s868_s17, 3  ;;  %s566_s29 = sshll.u32 %s963_s28, 3 }
  0x2a   : > { %s567_s30 = sshll.u32 %s864_s16, 7  ;;  %s190_s18 = scalar_lea.vmem [#allocation5], %s566_s29 }
  0x2b   : > { %p990_p5 = pnand %p568_p1, %p203_p3  ;;  %s196_s11 = scalar_lea.hbm %s1158_s1, %s567_s30 }
  0x2c   : > { %s198_s19 = sshll.u32 %s190_s18, 4  ;;  %s187_s21 = scalar_lea.sflag [#allocation6], %s963_s28  ;;  %s199_s19 = int_to_ptr.vmem [resolvable:$true] %s198_s19 }
  0x2d   : > { %s739_s0 = scalar_lea.vmem %s199_s19, 128  ;;  %s873_s6 = smov [#allocation5]  }
  0x2e   : > { %p740_p6 = scmp.ne.s32.totalorder %s199_s19, %s739_s0  ;;  %s744_s8 = sshll.u32 %s873_s6, 4  ;;  %s745_s8 = int_to_ptr.vmem [resolvable:$false] %s744_s8 }
  0x2f   : > { %s746_s10 = scalar_lea.vmem %s745_s8, 256  ;;  %p747_p1 = scmp.lt.s32.totalorder %s199_s19, %s745_s8 }
  0x30   : > { %p742_p4 = pnand %p740_p6, %p700_p2  ;;  %p748_p10 = scmp.lt.s32.totalorder %s746_s10, %s739_s0 }
  0x32   : > { %p743_p7 = pneg %p742_p4  ;;  %p749_p13 = por %p748_p10, %p747_p1 }
  0x34   : > { %p750_p3 = pnand %p749_p13, %p743_p7 }
  0x36   : > { %753 = shalt.err (!%p750_p3)
}
  0x37   : > { %617 = dma.hbm_to_vmem [thread:$0]  (!%p972_p0), %s196_s11, 128, %s199_s19, %s187_s21  }
  0x38   : > { %207 = sbr.rel (%p990_p5) target bundleno = 158 (0x9e), region = 28  ;;  %s1006_s28 = sand.u32 (!%p990_p5), 1, %s852_s13  }
  0x39   : > { %s1009_s22 = sshll.u32 (!%p990_p5), %s1006_s28, 5  ;;  %s210_s23 = scalar_lea.sflag (!%p990_p5), [#allocation3], %s1006_s28 }
  0x3a   : > { %s213_s0 = scalar_lea.vmem (!%p990_p5), [#allocation2], %s1009_s22 }
  0x3d   : > { %831 = dma.done.wait (%p945_p8), %s210_s23, 512  }
  0x3e   : > { %833 = vsyncadd (%p945_p8), %s210_s23, 4294966784  ;;  %s570_s9 = sshll.u32 %s1006_s28, 3  ;;  %s219_s29 = scalar_lea.sflag [#allocation6], %s1006_s28 }
  0x3f   : > { %s222_s30 = scalar_lea.vmem [#allocation5], %s570_s9 }
  0x40   : > { %835 = dma.done.wait (%p945_p8), %s219_s29, 128  }
  0x41   : > { %837 = vsyncadd (%p945_p8), %s219_s29, 4294967168  ;;  %v268_v0 = vld [vmem:[%s213_s0] sm:$0xff]  ;;  %v573_v1 = vld [vmem:[%s213_s0 + $0x8] sm:$0xff]  ;;  %s601_s24 = sshll.u32 %s860_s15, 9  ;;  %s254_s4 = scalar_lea.vmem [#allocation8], %s1009_s22 }
  0x42   : > { %v574_v2 = vld [vmem:[%s213_s0 + $0x10] sm:$0xff]  ;;  %v275_v3 = vmax.f32 %v268_v0, %v573_v1  ;;  %v575_v4 = vld [vmem:[%s213_s0 + $0x18] sm:$0xff]  ;;  %v267_v22 = vld [vmem:[%s222_s30] sm:$0xff]  ;;  %s420_s5 = sshll.u32 %s254_s4, 4  ;;  %s1044_s18 = scalar_lea.hbm %s1160_s3, %s601_s24  ;;  %s1046_s5 = int_to_ptr.vmem [resolvable:$true] %s420_s5 }
  0x43   : > { %vm299_vm0 = vcmp.eq.s32.totalorder %v267_v22, 0  ;;  %vm319_vm1 = vcmp.eq.s32.totalorder %v267_v22, 1  ;;  %vm341_vm2 = vcmp.eq.s32.totalorder %v267_v22, 2  ;;  %vm363_vm3 = vcmp.eq.s32.totalorder %v267_v22, 3  ;;  %s391_s19 = scalar_lea.sflag [#allocation9], %s1006_s28  ;;  %s754_s21 = scalar_lea.vmem %s1046_s5, 512 }
  0x44   : > { %v276_v5 = vmax.f32 %v275_v3, %v574_v2  ;;  %p755_p8 = scmp.ne.s32.totalorder %s1046_s5, %s754_s21  ;;  %s874_s6 = smov [#allocation8]  }
  0x45   : > { %s758_s8 = sshll.u32 %s874_s6, 4  ;;  %s759_s8 = int_to_ptr.vmem [resolvable:$false] %s758_s8 }
  0x46   : > { %v277_v6 = vmax.f32 %v276_v5, %v575_v4  ;;  %p756_p0 = pnand %p755_p8, %p949_p9  ;;  %s760_s10 = scalar_lea.vmem %s759_s8, 1024 }
  0x47   : > { %p761_p5 = scmp.lt.s32.totalorder %s1046_s5, %s759_s8  ;;  %p762_p6 = scmp.lt.s32.totalorder %s760_s10, %s754_s21 }
  0x48   : > { %v278_v7 = vsub.f32 %v268_v0, %v277_v6  ;;  %v281_v8 = vsub.f32 %v573_v1, %v277_v6  ;;  %v284_v9 = vsub.f32 %v574_v2, %v277_v6  ;;  %v287_v10 = vsub.f32 %v575_v4, %v277_v6  ;;  %p757_p2 = pneg %p756_p0 }
  0x49   : > { %p763_p4 = por %p762_p6, %p761_p5 }
  0x4a   : > { %v279_v11 = vmul.f32 1.442695, %v278_v7  ;;  %v282_v12 = vmul.f32 1.442695, %v281_v8  ;;  %v285_v13 = vmul.f32 1.442695, %v284_v9 }
  0x4b   : > { %v288_v14 = vmul.f32 1.442695, %v287_v10  ;;  %p764_p7 = pnand %p763_p4, %p757_p2 }
  0x4c   : > { %680 = vpow2.f32 %v279_v11 }
  0x4d   : > { %682 = vpow2.f32 %v282_v12 }
  0x4e   : > { %684 = vpow2.f32 %v285_v13 }
  0x4f   : > { %686 = vpow2.f32 %v288_v14 }
  0x59   : > { %v681_v15 = vpop.eup %680 }
  0x5a   : > { %v683_v16 = vpop.eup %682 }
  0x5b   : > { %v685_v17 = vpop.eup %684  ;;  %v290_v18 = vadd.f32 %v683_v16, %v681_v15 }
  0x5c   : > { %v687_v19 = vpop.eup %686 }
  0x5d   : > { %v291_v20 = vadd.f32 %v685_v17, %v290_v18 }
  0x5f   : > { %v292_v21 = vadd.f32 %v687_v19, %v291_v20 }
  0x61   : > { %688 = vrcp.f32 %v292_v21 }
  0x6e   : > { %v689_v23 = vpop.eup %688 }
  0x6f   : > { %v295_v24 = vmul.f32 %v689_v23, %v681_v15  ;;  %v296_v25 = vmul.f32 %v689_v23, %v683_v16  ;;  %v297_v26 = vmul.f32 %v689_v23, %v685_v17  ;;  %v298_v27 = vmul.f32 %v689_v23, %v687_v19 }
  0x71   : > { %v576_v28 = vadd.f32 -1.0, %v295_v24  ;;  %v311_v29 = vadd.f32 1.0, %v295_v24  ;;  %v577_v30 = vadd.f32 -1.0, %v296_v25  ;;  %v331_v31 = vadd.f32 1.0, %v296_v25 }
  0x72   : > { %v582_v32 = vadd.f32 -1.0, %v297_v26  ;;  %v353_v33 = vadd.f32 1.0, %v297_v26  ;;  %v587_v34 = vadd.f32 -1.0, %v298_v27  ;;  %v375_v35 = vadd.f32 1.0, %v298_v27 }
  0x73   : > { %v301_v36 = vsel %vm299_vm0, %v576_v28, %v295_v24  ;;  %v312_v37 = vsel %vm299_vm0, %v311_v29, %v295_v24  ;;  %v321_v38 = vsel %vm319_vm1, %v577_v30, %v296_v25  ;;  %v332_v39 = vsel %vm319_vm1, %v331_v31, %v296_v25 }
  0x74   : > { %v1023_v40 = vand.u32 2147483647, %v301_v36  ;;  %v1025_v41 = vand.u32 2147483647, %v321_v38  ;;  %v343_v42 = vsel %vm341_vm2, %v582_v32, %v297_v26  ;;  %v354_v43 = vsel %vm341_vm2, %v353_v33, %v297_v26  ;;  %318 = vst [vmem:[%s254_s4] sm:$0xff] %v312_v37  ;;  %581 = vst [vmem:[%s254_s4 + $0x8] sm:$0xff] %v332_v39 }
  0x75   : > { %v365_v44 = vsel %vm363_vm3, %v587_v34, %v298_v27  ;;  %v376_v45 = vsel %vm363_vm3, %v375_v35, %v298_v27  ;;  %v1035_v46 = vand.u32 2147483647, %v343_v42  ;;  %586 = vst [vmem:[%s254_s4 + $0x10] sm:$0xff] %v354_v43 }
  0x76   : > { %690 = vrsqrt.f32 %v1023_v40  ;;  %v1037_v47 = vand.u32 2147483647, %v365_v44  ;;  %591 = vst [vmem:[%s254_s4 + $0x18] sm:$0xff] %v376_v45 }
  0x77   : > { %692 = vrsqrt.f32 %v1025_v41 }
  0x78   : > { %694 = vrsqrt.f32 %v1035_v46 }
  0x79   : > { %696 = vrsqrt.f32 %v1037_v47 }
  0x7a   : > { %767 = shalt.err (!%p764_p7)
}
  0x7b   : > { %s768_s23 = scalar_lea.hbm %s1044_s18, 512  ;;  %s772_s29 = scalar_lea.hbm %s1160_s3, 1024 }
  0x7c   : > { %p769_p1 = scmp.ne.s32.totalorder %s1044_s18, %s768_s23  ;;  %p773_p3 = scmp.lt.s32.totalorder %s1044_s18, %s1160_s3 }
  0x7d   : > { %p774_p8 = scmp.lt.s32.totalorder %s772_s29, %s768_s23 }
  0x7e   : > { %p770_p10 = pnand %p769_p1, %p949_p9 }
  0x7f   : > { %p775_p0 = por %p774_p8, %p773_p3 }
  0x80   : > { %p771_p13 = pneg %p770_p10 }
  0x82   : > { %p776_p2 = pnand %p775_p0, %p771_p13 }
  0x84   : > { %779 = shalt.err (!%p776_p2)
}
  0x85   : > { %s875_s7 = smov 128   ;;  %s876_s11 = smov 8   ;;  %v691_v48 = vpop.eup %690  ;;  %vm305_vm4 = vcmp.eq.f32.partialorder %v1023_v40, inf  ;;  %v308_v49 = vand.u32 2147483648, %v1023_v40  ;;  %vm307_vm5 = vcmp.eq.f32.partialorder %v1023_v40, 0.0  ;;  %vm325_vm6 = vcmp.eq.f32.partialorder %v1025_v41, inf }
  0x86   : > { %608 = dma.vmem_to_hbm [thread:$0]  (%p949_p9), %s1046_s5, 512, %s1044_s18, %s391_s19, %s875_s7, %s875_s7, %s876_s11   ;;  %v693_v50 = vpop.eup %692  ;;  %v304_v51 = vmul.f32 %v691_v48, %v1023_v40  ;;  %v328_v52 = vand.u32 2147483648, %v1025_v41  ;;  %vm327_vm7 = vcmp.eq.f32.partialorder %v1025_v41, 0.0  ;;  %vm347_vm8 = vcmp.eq.f32.partialorder %v1035_v46, inf }
  0x87   : > { %v324_v53 = vmul.f32 %v693_v50, %v1025_v41  ;;  %vm349_vm9 = vcmp.eq.f32.partialorder %v1035_v46, 0.0  ;;  %v695_v55 = vpop.eup %694  ;;  %v350_v58 = vand.u32 2147483648, %v1035_v46  ;;  %vm369_vm10 = vcmp.eq.f32.partialorder %v1037_v47, inf  ;;  %s247_s5 = scalar_lea.vmem [#allocation7], %s1009_s22  ;;  %s1106_s6 = scalar_lea.hbm %s1159_s2, %s601_s24 }
  0x88   : > { %v306_v54 = vsel %vm305_vm4, %v1023_v40, %v304_v51  ;;  %v697_v59 = vpop.eup %696  ;;  %v346_v62 = vmul.f32 %v695_v55, %v1035_v46  ;;  %v372_v63 = vand.u32 2147483648, %v1037_v47  ;;  %vm371_vm11 = vcmp.eq.f32.partialorder %v1037_v47, 0.0  ;;  %s404_s18 = sshll.u32 %s247_s5, 4  ;;  %s386_s22 = scalar_lea.sflag [#allocation4], %s1006_s28  ;;  %s1108_s18 = int_to_ptr.vmem [resolvable:$true] %s404_s18 }
  0x89   : > { %v309_v56 = vsel %vm307_vm5, %v308_v49, %v306_v54  ;;  %v326_v57 = vsel %vm325_vm6, %v1025_v41, %v324_v53  ;;  %v368_v1 = vmul.f32 %v697_v59, %v1037_v47  ;;  %s780_s8 = scalar_lea.vmem %s1108_s18, 512  ;;  %s877_s10 = smov [#allocation7]  }
  0x8a   : > { %v310_v60 = vmul.f32 %v309_v56, %v1023_v40  ;;  %v329_v61 = vsel %vm327_vm7, %v328_v52, %v326_v57  ;;  %v348_v2 = vsel %vm347_vm8, %v1035_v46, %v346_v62  ;;  %p781_p5 = scmp.ne.s32.totalorder %s1108_s18, %s780_s8  ;;  %s784_s15 = sshll.u32 %s877_s10, 4  ;;  %s785_s15 = int_to_ptr.vmem [resolvable:$false] %s784_s15 }
  0x8b   : > { %v330_v0 = vmul.f32 %v329_v61, %v1025_v41  ;;  %v351_v3 = vsel %vm349_vm9, %v350_v58, %v348_v2  ;;  %v370_v4 = vsel %vm369_vm10, %v1037_v47, %v368_v1  ;;  %s786_s23 = scalar_lea.vmem %s785_s15, 1024  ;;  %p787_p7 = scmp.lt.s32.totalorder %s1108_s18, %s785_s15 }
  0x8c   : > { %315 = vst [vmem:[%s247_s5] sm:$0xff] %v310_v60  ;;  %v352_v5 = vmul.f32 %v351_v3, %v1035_v46  ;;  %v373_v6 = vsel %vm371_vm11, %v372_v63, %v370_v4  ;;  %p782_p6 = pnand %p781_p5, %p949_p9  ;;  %p788_p1 = scmp.lt.s32.totalorder %s786_s23, %s780_s8 }
  0x8d   : > { %579 = vst [vmem:[%s247_s5 + $0x8] sm:$0xff] %v330_v0  ;;  %v374_v7 = vmul.f32 %v373_v6, %v1037_v47 }
  0x8e   : > { %584 = vst [vmem:[%s247_s5 + $0x10] sm:$0xff] %v352_v5  ;;  %p783_p4 = pneg %p782_p6  ;;  %p789_p10 = por %p788_p1, %p787_p7 }
  0x8f   : > { %589 = vst [vmem:[%s247_s5 + $0x18] sm:$0xff] %v374_v7 }
  0x90   : > { %p790_p13 = pnand %p789_p10, %p783_p4 }
  0x92   : > { %793 = shalt.err (!%p790_p13)
}
  0x93   : > { %s794_s24 = scalar_lea.hbm %s1106_s6, 512  ;;  %s798_s9 = scalar_lea.hbm %s1159_s2, 1024 }
  0x94   : > { %p795_p3 = scmp.ne.s32.totalorder %s1106_s6, %s794_s24  ;;  %p799_p2 = scmp.lt.s32.totalorder %s1106_s6, %s1159_s2 }
  0x95   : > { %p800_p5 = scmp.lt.s32.totalorder %s798_s9, %s794_s24 }
  0x96   : > { %p796_p8 = pnand %p795_p3, %p949_p9 }
  0x97   : > { %p801_p6 = por %p800_p5, %p799_p2 }
  0x98   : > { %p797_p0 = pneg %p796_p8 }
  0x9a   : > { %p802_p4 = pnand %p801_p6, %p797_p0 }
  0x9c   : > { %805 = shalt.err (!%p802_p4)
}
  0x9d   : > { %607 = dma.vmem_to_hbm [thread:$0]  (%p949_p9), %s1108_s18, 512, %s1106_s6, %s386_s22, %s875_s7, %s875_s7, %s876_s11  }
  0x9e PF: > { %s435_s4 = sand.u32 1, %s848_s12   ;;  %p619_p7 = pnand %p562_p12, %p956_p11 }
  0x9f   : > { %s436_s5 = scalar_lea.sflag [#allocation4], %s435_s4 }
  0xa0   : > { %p620_p1 = pneg %p619_p7 }
  0xa2   : > { %839 = dma.done.wait (%p620_p1), %s436_s5, 512  }
  0xa3   : > { %841 = vsyncadd (%p620_p1), %s436_s5, 4294966784  ;;  %s445_s19 = scalar_lea.sflag [#allocation9], %s435_s4 }
  0xa4   : > { %843 = dma.done.wait (%p620_p1), %s445_s19, 512  }
  0xa5   : > { %845 = vsyncadd (%p620_p1), %s445_s19, 4294966784  ;;  %s26_s17 = sadd.s32 1, %s868_s17   ;;  %s1169_s12 = smov %s852_s13 }
  0xa6   : > { %p23_p10 = scmp.ge.s32.totalorder %s26_s17, 4   ;;  %s1170_s13 = smov %s856_s14 }
  0xa7   : > { %s1171_s14 = smov %s954_s26  ;;  %s1172_s15 = smov %s864_s16 }
  0xa8   : > { %s1173_s16 = smov %s1175_s20  ;;  %25 = sbr.rel (!%p23_p10) target bundleno = 12 (0xc), region = 116 }
  0xad   :  { %450 = vsyncpa [#allocation3], 1 }
  0xae   :  { %452 = vsyncpa [#allocation3 + $0x1], 1 }
  0xaf   :  { %453 = vsyncpa [#allocation6], 1 }
  0xb0   :  { %455 = vsyncpa [#allocation6 + $0x1], 1 }
  0xb1   :  { %456 = vsyncpa [#allocation4], 1 }
  0xb2   :  { %458 = vsyncpa [#allocation4 + $0x1], 1 }
  0xb3   :  { %459 = vsyncpa [#allocation9], 1 }
  0xb4   :  { %461 = vsyncpa [#allocation9 + $0x1], 1 }

</bundles_post_ra>
